<compile_context>
chip_gen: v7x
topology: tpu7x:2x2x1
jax: 0.10.0
libtpu: 0.0.40
codegen_flags: <defaults>
</compile_context>

<pallas_src>
import jax
import jax.numpy as jnp
from jax.experimental import pallas as pl
from jax.experimental.pallas import tpu as pltpu

_BN_EPS = 1e-5
_H1, _H2, _H3 = 128, 128, 64     # hidden widths of fc1 / fc2 / fc3
_LANE = 128                      # TPU lane width; packed-vector / output slab width

# Row layout of the packed [8, 128] per-feature vector slab.
_ROW_GAMMA, _ROW_BETA, _ROW_B2, _ROW_B3, _ROW_B4, _ROW_SCALE, _ROW_SHIFT = range(7)

_UNTILED_BATCH_MAX = 2048        # rows handled by the single-shot kernel
_ROW_TILE = 512                  # batch tile for the large-batch path
_VMEM_LIMIT = 48 * 1024 * 1024   # explicit scoped-VMEM limit, safe on v7x (64 MiB phys)


def _mm(a, w234_ref, idx):
    """a @ w234_ref[idx] on the MXU with f32 accumulation."""
    w = w234_ref[idx]                 # static index -> [128, 128] tile
    if a.dtype != w.dtype:            # trace-time: cast activations when weights are
        a = a.astype(w.dtype)         # bf16 (MXU-native everywhere); acc stays f32
    return jnp.dot(a, w, preferred_element_type=jnp.float32)


def _actor_untiled_kernel(x_ref, w1_ref, w234_ref, vecs_ref, out_ref):
    """Single-shot path: exact in-kernel (training-mode) BatchNorm statistics."""
    gamma = vecs_ref[_ROW_GAMMA:_ROW_GAMMA + 1, :]
    beta  = vecs_ref[_ROW_BETA:_ROW_BETA + 1, :]
    b2 = vecs_ref[_ROW_B2:_ROW_B2 + 1, :]
    b3 = vecs_ref[_ROW_B3:_ROW_B3 + 1, :]
    b4 = vecs_ref[_ROW_B4:_ROW_B4 + 1, :]

    # fc1 (b1 omitted: it cancels exactly under BN's batch-mean subtraction).
    h = jnp.dot(x_ref[...], w1_ref[...], preferred_element_type=jnp.float32)

    # BatchNorm1d training mode: batch stats, biased variance.  Centered tensor is
    # reused for variance AND normalization; rsqrt*gamma folded into one [1,128]
    # scale so the [B,128] broadcast is a single multiply + add.
    mean = jnp.mean(h, axis=0, keepdims=True)
    hc = h - mean
    var = jnp.mean(hc * hc, axis=0, keepdims=True)
    scale = jax.lax.rsqrt(var + _BN_EPS) * gamma
    h = jnp.maximum(hc * scale + beta, 0.0)

    h = jnp.maximum(_mm(h, w234_ref, 0) + b2, 0.0)      # fc2 + ReLU
    h = jnp.maximum(_mm(h, w234_ref, 1) + b3, 0.0)      # fc3 (zero-padded lanes) + ReLU
    out_ref[...] = jnp.tanh(_mm(h, w234_ref, 2) + b4)   # fc4 (zero-padded lanes) + tanh


def _fc1_stats_kernel(x_ref, w1_ref, stats_ref):
    """Pass 1 of the tiled path: accumulate per-feature sum / sum-of-squares of fc1(x)."""
    h = jnp.dot(x_ref[...], w1_ref[...], preferred_element_type=jnp.float32)
    blk = jnp.concatenate(
        [jnp.sum(h, axis=0, keepdims=True),
         jnp.sum(h * h, axis=0, keepdims=True)], axis=0)          # [2, 128]

    @pl.when(pl.program_id(0) == 0)
    def _():
        stats_ref[...] = jnp.zeros_like(stats_ref)

    stats_ref[...] += blk


def _actor_tiled_kernel(x_ref, w1_ref, w234_ref, vecs_ref, out_ref):
    """Pass 2 of the tiled path: full MLP per row tile with precomputed BN scale/shift."""
    b2 = vecs_ref[_ROW_B2:_ROW_B2 + 1, :]
    b3 = vecs_ref[_ROW_B3:_ROW_B3 + 1, :]
    b4 = vecs_ref[_ROW_B4:_ROW_B4 + 1, :]
    scale = vecs_ref[_ROW_SCALE:_ROW_SCALE + 1, :]
    shift = vecs_ref[_ROW_SHIFT:_ROW_SHIFT + 1, :]

    h = jnp.dot(x_ref[...], w1_ref[...], preferred_element_type=jnp.float32)
    h = jnp.maximum(h * scale + shift, 0.0)              # folded BN + ReLU
    h = jnp.maximum(_mm(h, w234_ref, 0) + b2, 0.0)
    h = jnp.maximum(_mm(h, w234_ref, 1) + b3, 0.0)
    out_ref[...] = jnp.tanh(_mm(h, w234_ref, 2) + b4)


def pack_actor_params(params, weight_dtype=jnp.float32):
    """Coalesce per-layer parameters into 3 kernel inputs (pack once, call many).

    weight_dtype=jnp.bfloat16 halves fc2-fc4 weight DMA bytes and feeds the MXU its
    native dtype on every TPU generation (v5e/v6e/v7x); only the MXU sees these
    weights, all elementwise math and accumulation stay f32.  Keep the float32
    default when tight agreement with an f32 reference is required.
    """
    w1, b1, gamma, beta, w2, b2, w3, b3, w4, b4 = params
    del b1  # cancels exactly under training-mode BatchNorm (mean subtraction)
    num_actions = w4.shape[1]
    assert w3.shape[1] <= _LANE and num_actions <= _LANE

    def pad2d(v, rows, cols):
        r, c = v.shape
        return jnp.pad(v, ((0, rows - r), (0, cols - c)))

    w3p = pad2d(w3, _H2, _LANE)                             # [128,128], zero cols 64:
    w4p = pad2d(w4, _LANE, _LANE)                           # [128,128], zero rows 64:, cols A:
    w234 = jnp.stack([w2, w3p, w4p]).astype(weight_dtype)   # [3, 128, 128]

    vecs = jnp.concatenate(
        [gamma, beta, b2, pad2d(b3, 1, _LANE), pad2d(b4, 1, _LANE),
         jnp.zeros((3, _LANE), jnp.float32)],               # rows 5/6 reused per call
        axis=0).astype(jnp.float32)                         # [8, 128]

    return {"w1": w1.astype(jnp.float32), "w234": w234, "vecs": vecs,
            "num_actions": num_actions}


def _cost_estimate(batch, state_size, x, w1, w234, vecs):
    # fc3/fc4 execute as padded 128-lane matmuls; count what is actually issued.
    flops = 2 * batch * (state_size * _H1 + 3 * _LANE * _LANE)
    transcendentals = batch * _LANE + _H1        # tanh on the output slab + rsqrt
    bytes_accessed = sum(int(a.size) * a.dtype.itemsize for a in (x, w1, w234, vecs))
    bytes_accessed += batch * _LANE * 4          # output slab
    return pl.CostEstimate(flops=flops, transcendentals=transcendentals,
                           bytes_accessed=bytes_accessed)


def _forward_untiled(x, w1, w234, vecs):
    B, S = x.shape
    vmem = pl.BlockSpec(memory_space=pltpu.MemorySpace.VMEM)
    return pl.pallas_call(
        _actor_untiled_kernel,
        out_shape=jax.ShapeDtypeStruct((B, _LANE), jnp.float32),   # lane-dense slab
        in_specs=[vmem, vmem, vmem, vmem],
        out_specs=vmem,
        compiler_params=pltpu.CompilerParams(vmem_limit_bytes=_VMEM_LIMIT),
        cost_estimate=_cost_estimate(B, S, x, w1, w234, vecs),
    )(x, w1, w234, vecs)


def _forward_tiled(x, w1, w234, vecs, row_tile):
    B, S = x.shape
    n_tiles = pl.cdiv(B, row_tile)
    b_pad = n_tiles * row_tile
    if b_pad != B:
        x = jnp.pad(x, ((0, b_pad - B), (0, 0)))   # zero rows: inert for the BN sums

    x_spec = pl.BlockSpec((row_tile, S), lambda t: (t, 0))
    w1_spec = pl.BlockSpec((S, _H1), lambda t: (0, 0))
    w234_spec = pl.BlockSpec(w234.shape, lambda t: (0, 0, 0))
    vecs_spec = pl.BlockSpec((8, _LANE), lambda t: (0, 0))

    # Pass 1: per-feature sum / sum-of-squares of fc1(x), accumulated on-chip.
    stats = pl.pallas_call(
        _fc1_stats_kernel,
        grid=(n_tiles,),
        out_shape=jax.ShapeDtypeStruct((2, _LANE), jnp.float32),
        in_specs=[x_spec, w1_spec],
        out_specs=pl.BlockSpec((2, _LANE), lambda t: (0, 0)),
        compiler_params=pltpu.CompilerParams(
            dimension_semantics=("arbitrary",),
            vmem_limit_bytes=_VMEM_LIMIT),
    )(x, w1)

    # Fold batch stats (true B, biased variance) into BN scale/shift.
    inv_b = 1.0 / float(B)
    mean = stats[0] * inv_b
    var = jnp.maximum(stats[1] * inv_b - mean * mean, 0.0)
    gamma, beta = vecs[_ROW_GAMMA], vecs[_ROW_BETA]
    scale = gamma * jax.lax.rsqrt(var + _BN_EPS)
    shift = beta - mean * scale
    vecs = vecs.at[_ROW_SCALE, :].set(scale).at[_ROW_SHIFT, :].set(shift)

    # Pass 2: full MLP per row tile; weights stay VMEM-resident (constant
    # index_maps); batch axis "parallel" so v7x's two TensorCores split tiles.
    return pl.pallas_call(
        _actor_tiled_kernel,
        grid=(n_tiles,),
        out_shape=jax.ShapeDtypeStruct((b_pad, _LANE), jnp.float32),
        in_specs=[x_spec, w1_spec, w234_spec, vecs_spec],
        out_specs=pl.BlockSpec((row_tile, _LANE), lambda t: (t, 0)),
        compiler_params=pltpu.CompilerParams(
            dimension_semantics=("parallel",),
            vmem_limit_bytes=_VMEM_LIMIT),
        cost_estimate=_cost_estimate(b_pad, S, x, w1, w234, vecs),
    )(x, w1, w234, vecs)


def actor_forward(x, packed, *, untiled_batch_max=_UNTILED_BATCH_MAX,
                  row_tile=_ROW_TILE):
    """x: [B, state_size] -> [B, num_actions] float32."""
    if x.dtype != jnp.float32:
        x = x.astype(jnp.float32)
    w1, w234, vecs = packed["w1"], packed["w234"], packed["vecs"]
    num_actions = packed["num_actions"]
    B = x.shape[0]

    if B <= untiled_batch_max:
        out = _forward_untiled(x, w1, w234, vecs)
    else:
        out = _forward_tiled(x, w1, w234, vecs, row_tile)
    return out[:B, :num_actions]


def init_actor_params(key, state_size, num_actions):
    """Deterministic init matching PyTorch nn.Linear defaults (U[-1/sqrt(fan_in), +])."""
    dims = [(state_size, _H1), (_H1, _H2), (_H2, _H3), (_H3, num_actions)]
    params = []
    gamma = beta = None
    for i, (fan_in, fan_out) in enumerate(dims):
        key, kw, kb = jax.random.split(key, 3)
        bound = 1.0 / jnp.sqrt(float(fan_in))
        w = jax.random.uniform(kw, (fan_in, fan_out), jnp.float32, -bound, bound)
        b = jax.random.uniform(kb, (1, fan_out), jnp.float32, -bound, bound)
        params.append((w, b))
        if i == 0:
            gamma = jnp.ones((1, _H1), jnp.float32)   # BatchNorm1d(128) defaults
            beta = jnp.zeros((1, _H1), jnp.float32)
    (w1, b1), (w2, b2), (w3, b3), (w4, b4) = params
    return (w1, b1, gamma, beta, w2, b2, w3, b3, w4, b4)


def actor_reference(x, params):
    """Pure-JAX reference for correctness checking (f32 accumulation)."""
    w1, b1, gamma, beta, w2, b2, w3, b3, w4, b4 = params
    hi = jax.lax.Precision.HIGHEST
    h = jnp.dot(x, w1, precision=hi) + b1
    mean = jnp.mean(h, axis=0, keepdims=True)
    var = jnp.mean((h - mean) ** 2, axis=0, keepdims=True)
    h = (h - mean) / jnp.sqrt(var + _BN_EPS) * gamma + beta
    h = jax.nn.relu(h)
    h = jax.nn.relu(jnp.dot(h, w2, precision=hi) + b2)
    h = jax.nn.relu(jnp.dot(h, w3, precision=hi) + b3)
    return jnp.tanh(jnp.dot(h, w4, precision=hi) + b4)


if __name__ == "__main__":
    key = jax.random.PRNGKey(0)
    state_size, num_actions = 16, 4

    key, kp, kx1, kx2 = jax.random.split(key, 4)
    params = init_actor_params(kp, state_size, num_actions)
    packed = pack_actor_params(params)

    # 1) Small-batch (untiled, exact in-kernel BN) path.
    x_small = jax.random.normal(kx1, (8, state_size), jnp.float32)
    out_small = jax.block_until_ready(actor_forward(x_small, packed))
    ref_small = actor_reference(x_small, params)
    assert out_small.shape == (8, num_actions), out_small.shape
    err = float(jnp.max(jnp.abs(out_small - ref_small)))
    assert jnp.allclose(out_small, ref_small, atol=2e-5, rtol=1e-4), err

    # 2) Large-batch (tiled, two-pass BN stats, "parallel" batch grid) path.
    x_big = jax.random.normal(kx2, (777, state_size), jnp.float32)
    out_big = jax.block_until_ready(
        actor_forward(x_big, packed, untiled_batch_max=0, row_tile=256))
    ref_big = actor_reference(x_big, params)
    assert out_big.shape == (777, num_actions), out_big.shape
    err = float(jnp.max(jnp.abs(out_big - ref_big)))
    assert jnp.allclose(out_big, ref_big, atol=1e-4, rtol=1e-4), err

    # 3) bf16 weight option (MXU-native on every generation); looser tolerance.
    packed_bf16 = pack_actor_params(params, weight_dtype=jnp.bfloat16)
    out_bf16 = jax.block_until_ready(actor_forward(x_small, packed_bf16))
    err = float(jnp.max(jnp.abs(out_bf16 - ref_small)))
    assert jnp.allclose(out_bf16, ref_small, atol=5e-2, rtol=5e-2), err

    print("KERNEL_OK")
</pallas_src>

<mosaic_0001>
module attributes {stable_mosaic.version = 11 : i64} {
  func.func @_actor_untiled_kernel(%arg0: memref<8x16xf32, #tpu.memory_space<vmem>>, %arg1: memref<16x128xf32, #tpu.memory_space<vmem>>, %arg2: memref<3x128x128xf32, #tpu.memory_space<vmem>>, %arg3: memref<8x128xf32, #tpu.memory_space<vmem>>, %arg4: memref<8x128xf32, #tpu.memory_space<vmem>>) attributes {dimension_semantics = [], scalar_prefetch = 0 : i64, scratch_operands = 0 : i64, tpu.core_type = #tpu.core_type<tc>} {
    %c0 = arith.constant 0 : index
    %c0_0 = arith.constant 0 : index
    %0 = vector.load %arg3[%c0, %c0_0] : memref<8x128xf32, #tpu.memory_space<vmem>>, vector<1x128xf32>
    %c1 = arith.constant 1 : index
    %c0_1 = arith.constant 0 : index
    %1 = vector.load %arg3[%c1, %c0_1] : memref<8x128xf32, #tpu.memory_space<vmem>>, vector<1x128xf32>
    %c2 = arith.constant 2 : index
    %c0_2 = arith.constant 0 : index
    %2 = vector.load %arg3[%c2, %c0_2] : memref<8x128xf32, #tpu.memory_space<vmem>>, vector<1x128xf32>
    %c3 = arith.constant 3 : index
    %c0_3 = arith.constant 0 : index
    %3 = vector.load %arg3[%c3, %c0_3] : memref<8x128xf32, #tpu.memory_space<vmem>>, vector<1x128xf32>
    %c4 = arith.constant 4 : index
    %c0_4 = arith.constant 0 : index
    %4 = vector.load %arg3[%c4, %c0_4] : memref<8x128xf32, #tpu.memory_space<vmem>>, vector<1x128xf32>
    %c0_5 = arith.constant 0 : index
    %c0_6 = arith.constant 0 : index
    %5 = vector.load %arg0[%c0_5, %c0_6] : memref<8x16xf32, #tpu.memory_space<vmem>>, vector<8x16xf32>
    %c0_7 = arith.constant 0 : index
    %c0_8 = arith.constant 0 : index
    %6 = vector.load %arg1[%c0_7, %c0_8] : memref<16x128xf32, #tpu.memory_space<vmem>>, vector<16x128xf32>
    %cst = arith.constant dense<0.000000e+00> : vector<8x128xf32>
    %7 = tpu.matmul %5, %6, %cst {dimension_numbers = #tpu.dot_dimension_numbers<[1], [0], [0], [1], [0, 0, 1, 1], [], []>} : vector<8x16xf32>, vector<16x128xf32>, vector<8x128xf32> -> vector<8x128xf32>
    %cst_9 = arith.constant dense<0.000000e+00> : vector<128xf32>
    %8 = vector.multi_reduction <add>, %7, %cst_9 [0] : vector<8x128xf32> to vector<128xf32>
    %9 = vector.shape_cast %8 : vector<128xf32> to vector<1x128xf32>
    %cst_10 = arith.constant 8.000000e+00 : f32
    %10 = vector.broadcast %cst_10 : f32 to vector<1x128xf32>
    %11 = arith.divf %9, %10 : vector<1x128xf32>
    %12 = vector.broadcast %11 : vector<1x128xf32> to vector<8x128xf32>
    %13 = arith.subf %7, %12 : vector<8x128xf32>
    %14 = arith.mulf %13, %13 : vector<8x128xf32>
    %cst_11 = arith.constant dense<0.000000e+00> : vector<128xf32>
    %15 = vector.multi_reduction <add>, %14, %cst_11 [0] : vector<8x128xf32> to vector<128xf32>
    %16 = vector.shape_cast %15 : vector<128xf32> to vector<1x128xf32>
    %cst_12 = arith.constant 8.000000e+00 : f32
    %17 = vector.broadcast %cst_12 : f32 to vector<1x128xf32>
    %18 = arith.divf %16, %17 : vector<1x128xf32>
    %cst_13 = arith.constant 9.99999974E-6 : f32
    %19 = vector.broadcast %cst_13 : f32 to vector<1x128xf32>
    %20 = arith.addf %18, %19 : vector<1x128xf32>
    %21 = math.rsqrt %20 : vector<1x128xf32>
    %22 = arith.mulf %21, %0 : vector<1x128xf32>
    %23 = vector.broadcast %22 : vector<1x128xf32> to vector<8x128xf32>
    %24 = arith.mulf %13, %23 : vector<8x128xf32>
    %25 = vector.broadcast %1 : vector<1x128xf32> to vector<8x128xf32>
    %26 = arith.addf %24, %25 : vector<8x128xf32>
    %cst_14 = arith.constant 0.000000e+00 : f32
    %27 = vector.broadcast %cst_14 : f32 to vector<8x128xf32>
    %28 = arith.maximumf %26, %27 : vector<8x128xf32>
    %c0_15 = arith.constant 0 : index
    %c0_16 = arith.constant 0 : index
    %c0_17 = arith.constant 0 : index
    %29 = vector.load %arg2[%c0_15, %c0_16, %c0_17] : memref<3x128x128xf32, #tpu.memory_space<vmem>>, vector<1x128x128xf32>
    %30 = vector.shape_cast %29 : vector<1x128x128xf32> to vector<128x128xf32>
    %cst_18 = arith.constant dense<0.000000e+00> : vector<8x128xf32>
    %31 = tpu.matmul %28, %30, %cst_18 {dimension_numbers = #tpu.dot_dimension_numbers<[1], [0], [0], [1], [0, 0, 1, 1], [], []>} : vector<8x128xf32>, vector<128x128xf32>, vector<8x128xf32> -> vector<8x128xf32>
    %32 = vector.broadcast %2 : vector<1x128xf32> to vector<8x128xf32>
    %33 = arith.addf %31, %32 : vector<8x128xf32>
    %cst_19 = arith.constant 0.000000e+00 : f32
    %34 = vector.broadcast %cst_19 : f32 to vector<8x128xf32>
    %35 = arith.maximumf %33, %34 : vector<8x128xf32>
    %c1_20 = arith.constant 1 : index
    %c0_21 = arith.constant 0 : index
    %c0_22 = arith.constant 0 : index
    %36 = vector.load %arg2[%c1_20, %c0_21, %c0_22] : memref<3x128x128xf32, #tpu.memory_space<vmem>>, vector<1x128x128xf32>
    %37 = vector.shape_cast %36 : vector<1x128x128xf32> to vector<128x128xf32>
    %cst_23 = arith.constant dense<0.000000e+00> : vector<8x128xf32>
    %38 = tpu.matmul %35, %37, %cst_23 {dimension_numbers = #tpu.dot_dimension_numbers<[1], [0], [0], [1], [0, 0, 1, 1], [], []>} : vector<8x128xf32>, vector<128x128xf32>, vector<8x128xf32> -> vector<8x128xf32>
    %39 = vector.broadcast %3 : vector<1x128xf32> to vector<8x128xf32>
    %40 = arith.addf %38, %39 : vector<8x128xf32>
    %cst_24 = arith.constant 0.000000e+00 : f32
    %41 = vector.broadcast %cst_24 : f32 to vector<8x128xf32>
    %42 = arith.maximumf %40, %41 : vector<8x128xf32>
    %c2_25 = arith.constant 2 : index
    %c0_26 = arith.constant 0 : index
    %c0_27 = arith.constant 0 : index
    %43 = vector.load %arg2[%c2_25, %c0_26, %c0_27] : memref<3x128x128xf32, #tpu.memory_space<vmem>>, vector<1x128x128xf32>
    %44 = vector.shape_cast %43 : vector<1x128x128xf32> to vector<128x128xf32>
    %cst_28 = arith.constant dense<0.000000e+00> : vector<8x128xf32>
    %45 = tpu.matmul %42, %44, %cst_28 {dimension_numbers = #tpu.dot_dimension_numbers<[1], [0], [0], [1], [0, 0, 1, 1], [], []>} : vector<8x128xf32>, vector<128x128xf32>, vector<8x128xf32> -> vector<8x128xf32>
    %46 = vector.broadcast %4 : vector<1x128xf32> to vector<8x128xf32>
    %47 = arith.addf %45, %46 : vector<8x128xf32>
    %48 = math.tanh %47 : vector<8x128xf32>
    %c0_29 = arith.constant 0 : index
    %c0_30 = arith.constant 0 : index
    %49 = vector.load %arg4[%c0_29, %c0_30] : memref<8x128xf32, #tpu.memory_space<vmem>>, vector<8x128xf32>
    tpu.vector_store %arg4[%c0_29, %c0_30], %48 {strides = array<i32>} : memref<8x128xf32, #tpu.memory_space<vmem>>, vector<8x128xf32>,
    return
  }
}

</mosaic_0001>

<bundles_post_ra>
// kernel: tpu_custom_call.1
= control target key start
LH: loop header
LB: loop body
LE: loop exit
PB: predicated region body
PF: predicated region fallthrough
CT: control target
= control target key end

     0   :  { %9 = vsyncpa [#allocation3], 0  ;;  %s951_s0 = inlined_call_operand.hbm [shape: f32[8,16], index: 0, kind: input, shape index: {}]   ;;  %s952_s1 = inlined_call_operand.hbm [shape: f32[16,128], index: 1, kind: input, shape index: {}]   ;;  %s953_s2 = inlined_call_operand.hbm [shape: f32[3,128,128], index: 2, kind: input, shape index: {}]   ;;  %s954_s3 = inlined_call_operand.vmem [shape: f32[8,128], index: 3, kind: input, shape index: {}]   ;;  %s955_s4 = inlined_call_operand.hbm [shape: f32[8,128], index: 4, kind: output, shape index: {}]  }
   0x1   :  { %10 = vsyncpa [#allocation6], 0 }
   0x2   :  { %11 = vsyncpa [#allocation4], 0  ;;  %s815_s15 = smov [#allocation5]   ;;  %s721_s19 = scalar_lea.hbm %s952_s1, 256 }
   0x3   :  { %s27_s16 = sshll.u32 %s815_s15, 4  ;;  %p722_p0 = scmp.ne.s32.totalorder %s952_s1, %s721_s19  ;;  %s28_s16 = int_to_ptr.vmem [resolvable:$true] %s27_s16 }
   0x4   :  { %p725_p1 = scmp.lt.u32.totalorder %s721_s19, %s952_s1 }
   0x6   :  { %p727_p2 = pnand %p725_p1, %p722_p0 }
   0x8   :  { %730 = shalt.err (!%p727_p2)
}
   0x9   :  { %s731_s24 = scalar_lea.vmem %s28_s16, 256  ;;  %p736_p4 = scmp.lt.s32.totalorder %s28_s16, %s28_s16 }
   0xa   :  { %p732_p3 = scmp.ne.s32.totalorder %s28_s16, %s731_s24  ;;  %p737_p5 = scmp.lt.s32.totalorder %s731_s24, %s731_s24 }
   0xc   :  { %p738_p6 = por %p737_p5, %p736_p4 }
   0xe   :  { %p739_p7 = pnand %p738_p6, %p732_p3 }
  0x10   :  { %742 = shalt.err (!%p739_p7)
}
  0x11   :  { %s816_s25 = smov 128   ;;  %s817_s26 = smov 8  }
  0x12   :  { %33 = dma.hbm_to_vmem [thread:$0]  %s952_s1, 256, %s28_s16, [#allocation6], %s816_s25, %s816_s25, %s817_s26  }
  0x13   :  { %s818_s29 = smov [#allocation2]   ;;  %s819_s5 = smov [#allocation7]  }
  0x14   :  { %s18_s30 = sshll.u32 %s818_s29, 4  ;;  %s39_s6 = sshll.u32 %s819_s5, 4  ;;  %s19_s30 = int_to_ptr.vmem [resolvable:$true] %s18_s30  ;;  %s40_s6 = int_to_ptr.vmem [resolvable:$true] %s39_s6 }
  0x15   :  { %s743_s9 = scalar_lea.hbm %s951_s0, 128 }
  0x16   :  { %p744_p8 = scmp.ne.s32.totalorder %s951_s0, %s743_s9  ;;  %p747_p9 = scmp.lt.u32.totalorder %s743_s9, %s951_s0 }
  0x18   :  { %p749_p10 = pnand %p747_p9, %p744_p8 }
  0x1a   :  { %752 = shalt.err (!%p749_p10)
}
  0x1b   :  { %s753_s1 = scalar_lea.vmem %s19_s30, 128  ;;  %p758_p12 = scmp.lt.s32.totalorder %s19_s30, %s19_s30 }
  0x1c   :  { %p754_p11 = scmp.ne.s32.totalorder %s19_s30, %s753_s1  ;;  %p759_p13 = scmp.lt.s32.totalorder %s753_s1, %s753_s1 }
  0x1e   :  { %p760_p0 = por %p759_p13, %p758_p12 }
  0x20   :  { %p761_p1 = pnand %p760_p0, %p754_p11 }
  0x22   :  { %764 = shalt.err (!%p761_p1)
}
  0x23   :  { %21 = dma.hbm_to_vmem [thread:$0]  %s951_s0, 128, %s19_s30, [#allocation3]  }
  0x24   :  { %s765_s18 = scalar_lea.hbm %s953_s2, 6144 }
  0x25   :  { %p766_p2 = scmp.ne.s32.totalorder %s953_s2, %s765_s18  ;;  %p769_p3 = scmp.lt.u32.totalorder %s765_s18, %s953_s2 }
  0x27   :  { %p771_p4 = pnand %p769_p3, %p766_p2 }
  0x29   :  { %774 = shalt.err (!%p771_p4)
}
  0x2a   :  { %s775_s23 = scalar_lea.vmem %s40_s6, 6144  ;;  %p780_p6 = scmp.lt.s32.totalorder %s40_s6, %s40_s6 }
  0x2b   :  { %p776_p5 = scmp.ne.s32.totalorder %s40_s6, %s775_s23  ;;  %p781_p7 = scmp.lt.s32.totalorder %s775_s23, %s775_s23 }
  0x2d   :  { %p782_p8 = por %p781_p7, %p780_p6 }
  0x2f   :  { %p783_p9 = pnand %p782_p8, %p776_p5 }
  0x31   :  { %786 = shalt.err (!%p783_p9)
}
  0x32   :  { %45 = dma.hbm_to_vmem [thread:$0]  %s953_s2, 6144, %s40_s6, [#allocation6], %s816_s25, %s816_s25, %s817_s26  }
  0x33   :  { %809 = dma.done.wait [#allocation3], 128  }
  0x34   :  { %810 = vsyncadd [#allocation3], 4294967168 }
  0x35   :  { %811 = dma.done.wait [#allocation6], 6400  }
  0x36   :  { %812 = vsyncadd [#allocation6], 4294960896  ;;  %v820_v0 = vmov 0.0|0.0   ;;  %vm821_vm0 = vmmov 0   ;;  %v822_v1 = vmov 0.0   ;;  %v63_v2 = vld [vmem:[#allocation5] sm:$0xff] }
  0x37   :  { %633 = vmatprep.subr.bf16.mxu0 %v820_v0  ;;  %525 = vmatprep.mubr.msk.f32.mxu0 %vm821_vm0, %v822_v1  ;;  %v64_v3 = vld [vmem:[#allocation5 + $0x8] sm:$0xff]  ;;  %v62_v5 = vld [vmem:[#allocation2] sm:$0xff]  ;;  %vm65_vm1 = vcmask 130048   ;;  %v170_v6 = vld [vmem:[#allocation7] sm:$0xff]  ;;  %s823_s8 = smov [#allocation8]  }
  0x38   :  { %636 = vmatprep.subr.bf16.mxu1 %v820_v0  ;;  %560 = vmatprep.mubr.msk.f32.mxu1 %vm821_vm0, %v822_v1  ;;  %v634_v4 = vpack.c.bf16 %v64_v3, %v63_v2  ;;  %v171_v7 = vld [vmem:[#allocation7 + $0x8] sm:$0xff]  ;;  %v172_v9 = vld [vmem:[#allocation7 + $0x10] sm:$0xff]  ;;  %v173_v10 = vld [vmem:[#allocation7 + $0x18] sm:$0xff]  ;;  %s452_s9 = sshll.u32 %s823_s8, 4  ;;  %s453_s9 = int_to_ptr.vmem [resolvable:$true] %s452_s9 }
  0x39   :  { %v637_v8 = vpack.c.bf16 %v171_v7, %v170_v6  ;;  %v640_v11 = vpack.c.bf16 %v173_v10, %v172_v9  ;;  %v174_v12 = vld [vmem:[#allocation7 + $0x20] sm:$0xff]  ;;  %v175_v13 = vld [vmem:[#allocation7 + $0x28] sm:$0xff]  ;;  %v176_v15 = vld [vmem:[#allocation7 + $0x30] sm:$0xff]  ;;  %s787_s10 = scalar_lea.vmem %s453_s9, 128  ;;  %p792_p11 = scmp.lt.s32.totalorder %s453_s9, %s453_s9 }
  0x3a   :  { %635 = vmatpush3.bf16.msra.mxu0 %v634_v4  ;;  %v643_v14 = vpack.c.bf16 %v175_v13, %v174_v12  ;;  %v177_v16 = vld [vmem:[#allocation7 + $0x38] sm:$0xff]  ;;  %v178_v18 = vld [vmem:[#allocation7 + $0x40] sm:$0xff]  ;;  %v179_v19 = vld [vmem:[#allocation7 + $0x48] sm:$0xff]  ;;  %p788_p10 = scmp.ne.s32.totalorder %s453_s9, %s787_s10  ;;  %p793_p12 = scmp.lt.s32.totalorder %s787_s10, %s787_s10 }
  0x3b   :  { %660 = vmatprep.subr.bf16.mxu0 %v820_v0  ;;  %638 = vmatpush3.bf16.msra.mxu1 %v637_v8  ;;  %v646_v17 = vpack.c.bf16 %v177_v16, %v176_v15  ;;  %v649_v20 = vpack.c.bf16 %v179_v19, %v178_v18  ;;  %v180_v21 = vld [vmem:[#allocation7 + $0x50] sm:$0xff]  ;;  %v181_v22 = vld [vmem:[#allocation7 + $0x58] sm:$0xff]  ;;  %v182_v24 = vld [vmem:[#allocation7 + $0x60] sm:$0xff]  ;;  %v159_v8 = vlaneseq }
  0x3c   :  { %639 = vmatprep.subr.bf16.mxu1 %v820_v0  ;;  %v652_v23 = vpack.c.bf16 %v181_v22, %v180_v21  ;;  %v183_v25 = vld [vmem:[#allocation7 + $0x68] sm:$0xff]  ;;  %v184_v27 = vld [vmem:[#allocation7 + $0x70] sm:$0xff]  ;;  %v185_v28 = vld [vmem:[#allocation7 + $0x78] sm:$0xff]  ;;  %p794_p13 = por %p793_p12, %p792_p11 }
  0x3d   :  { %526 = vmatmul.mubr.msk.f32.vlgmr.msra.gmra.mrb[0].mxu0 %vm65_vm1, %v62_v5  ;;  %v655_v26 = vpack.c.bf16 %v183_v25, %v182_v24  ;;  %v658_v29 = vpack.c.bf16 %v185_v28, %v184_v27  ;;  %v262_v30 = vld [vmem:[#allocation7 + $0x80] sm:$0xff]  ;;  %v263_v31 = vld [vmem:[#allocation7 + $0x88] sm:$0xff]  ;;  %v264_v32 = vld [vmem:[#allocation7 + $0x90] sm:$0xff]  ;;  %v160_v9 = vshrl.u32 %v159_v8, 7 }
  0x3e   :  { %595 = vmatprep.mubr.msk.f32.mxu0 %vm821_vm0, %v822_v1  ;;  %v661_v33 = vpack.c.bf16 %v263_v31, %v262_v30  ;;  %v265_v34 = vld [vmem:[#allocation7 + $0x98] sm:$0xff]  ;;  %v266_v36 = vld [vmem:[#allocation7 + $0xa0] sm:$0xff]  ;;  %v267_v37 = vld [vmem:[#allocation7 + $0xa8] sm:$0xff]  ;;  %p795_p0 = pnand %p794_p13, %p788_p10 }
  0x3f   :  { %641 = vmatpush3.bf16.msra.mxu1 %v640_v11  ;;  %v664_v35 = vpack.c.bf16 %v265_v34, %v264_v32  ;;  %v667_v38 = vpack.c.bf16 %v267_v37, %v266_v36  ;;  %v268_v39 = vld [vmem:[#allocation7 + $0xb0] sm:$0xff]  ;;  %v269_v40 = vld [vmem:[#allocation7 + $0xb8] sm:$0xff]  ;;  %v270_v42 = vld [vmem:[#allocation7 + $0xc0] sm:$0xff]  ;;  %v161_v11 = vsub.s32 0, %v160_v9 }
  0x40   :  { %642 = vmatprep.subr.bf16.mxu1 %v820_v0  ;;  %662 = vmatpush3.bf16.msra.mxu0 %v661_v33  ;;  %v670_v41 = vpack.c.bf16 %v269_v40, %v268_v39  ;;  %v271_v43 = vld [vmem:[#allocation7 + $0xc8] sm:$0xff]  ;;  %v272_v45 = vld [vmem:[#allocation7 + $0xd0] sm:$0xff]  ;;  %v273_v46 = vld [vmem:[#allocation7 + $0xd8] sm:$0xff] }
  0x41   :  { %663 = vmatprep.subr.bf16.mxu0 %v820_v0  ;;  %v673_v44 = vpack.c.bf16 %v271_v43, %v270_v42  ;;  %v676_v47 = vpack.c.bf16 %v273_v46, %v272_v45  ;;  %v274_v48 = vld [vmem:[#allocation7 + $0xe0] sm:$0xff]  ;;  %v275_v49 = vld [vmem:[#allocation7 + $0xe8] sm:$0xff]  ;;  %v276_v19 = vld [vmem:[#allocation7 + $0xf0] sm:$0xff] }
  0x42   :  { %v679_v50 = vpack.c.bf16 %v275_v49, %v274_v48  ;;  %v57_v10 = vld [vmem:[%s954_s3] sm:$0x1]  ;;  %v463_v15 = vld [vmem:[%s954_s3 + $0x1] ss:$0 sm:$0xff]  ;;  %v354_v22 = vld [vmem:[#allocation7 + $0x100] sm:$0xff] }
  0x43   :  { %644 = vmatpush3.bf16.msra.mxu1 %v643_v14  ;;  %v356_v24 = vld [vmem:[#allocation7 + $0x110] sm:$0xff]  ;;  %v358_v28 = vld [vmem:[#allocation7 + $0x120] sm:$0xff]  ;;  %v361_v31 = vld [vmem:[#allocation7 + $0x138] sm:$0xff] }
  0x44   :  { %645 = vmatprep.subr.bf16.mxu1 %v820_v0  ;;  %665 = vmatpush3.bf16.msra.mxu0 %v664_v35  ;;  %v362_v33 = vld [vmem:[#allocation7 + $0x140] sm:$0xff]  ;;  %v363_v34 = vld [vmem:[#allocation7 + $0x148] sm:$0xff]  ;;  %v364_v36 = vld [vmem:[#allocation7 + $0x150] sm:$0xff] }
  0x45   :  { %666 = vmatprep.subr.bf16.mxu0 %v820_v0  ;;  %v697_v35 = vpack.c.bf16 %v363_v34, %v362_v33  ;;  %v365_v37 = vld [vmem:[#allocation7 + $0x158] sm:$0xff]  ;;  %v366_v39 = vld [vmem:[#allocation7 + $0x160] sm:$0xff]  ;;  %v367_v40 = vld [vmem:[#allocation7 + $0x168] sm:$0xff] }
  0x46   :  { %v464_v42 = vld [vmem:[%s954_s3 + $0x2] ss:$0 sm:$0xff]  ;;  %v369_v48 = vld [vmem:[#allocation7 + $0x178] sm:$0xff] }
  0x47   :  { %647 = vmatpush3.bf16.msra.mxu1 %v646_v17 }
  0x48   :  { %648 = vmatprep.subr.bf16.mxu1 %v820_v0  ;;  %668 = vmatpush3.bf16.msra.mxu0 %v667_v38  ;;  %v700_v38 = vpack.c.bf16 %v365_v37, %v364_v36 }
  0x49   :  { %669 = vmatprep.subr.bf16.mxu0 %v820_v0 }
  0x4b   :  { %650 = vmatpush3.bf16.msra.mxu1 %v649_v20  ;;  %v277_v20 = vld [vmem:[#allocation7 + $0xf8] sm:$0xff] }
  0x4c   :  { %651 = vmatprep.subr.bf16.mxu1 %v820_v0  ;;  %671 = vmatpush3.bf16.msra.mxu0 %v670_v41  ;;  %v682_v21 = vpack.c.bf16 %v277_v20, %v276_v19  ;;  %v703_v41 = vpack.c.bf16 %v367_v40, %v366_v39 }
  0x4d   :  { %672 = vmatprep.subr.bf16.mxu0 %v820_v0 }
  0x4f   :  { %653 = vmatpush3.bf16.msra.mxu1 %v652_v23  ;;  %v355_v23 = vld [vmem:[#allocation7 + $0x108] sm:$0xff] }
  0x50   :  { %654 = vmatprep.subr.bf16.mxu1 %v820_v0  ;;  %674 = vmatpush3.bf16.msra.mxu0 %v673_v44  ;;  %v685_v25 = vpack.c.bf16 %v355_v23, %v354_v22 }
  0x51   :  { %675 = vmatprep.subr.bf16.mxu0 %v820_v0 }
  0x53   :  { %656 = vmatpush3.bf16.msra.mxu1 %v655_v26  ;;  %v357_v26 = vld [vmem:[#allocation7 + $0x118] sm:$0xff] }
  0x54   :  { %657 = vmatprep.subr.bf16.mxu1 %v820_v0  ;;  %677 = vmatpush3.bf16.msra.mxu0 %v676_v47  ;;  %v688_v27 = vpack.c.bf16 %v357_v26, %v356_v24  ;;  %v368_v47 = vld [vmem:[#allocation7 + $0x170] sm:$0xff] }
  0x55   :  { %678 = vmatprep.subr.bf16.mxu0 %v820_v0  ;;  %v706_v49 = vpack.c.bf16 %v369_v48, %v368_v47 }
  0x57   :  { %659 = vmatpush3.bf16.msra.mxu1 %v658_v29  ;;  %v359_v29 = vld [vmem:[#allocation7 + $0x128] sm:$0xff] }
  0x58   :  { %684 = vmatprep.subr.bf16.mxu1 %v820_v0  ;;  %680 = vmatpush3.bf16.msra.mxu0 %v679_v50  ;;  %v691_v30 = vpack.c.bf16 %v359_v29, %v358_v28  ;;  %v465_v50 = vld [vmem:[%s954_s3 + $0x3] ss:$0 sm:$0xff] }
  0x59   :  { %681 = vmatprep.subr.bf16.mxu0 %v820_v0 }
  0x5c   :  { %683 = vmatpush3.bf16.msra.mxu0 %v682_v21 }
 0x110   :  { %v135_v51 = vpop.f32.mrb[0].mxu0 }
 0x111   :  { %v139_v52 = vrot.slane %v135_v51, 4  ;;  %v527_v53 = vpop.f32.mrb[1].mxu0 }
 0x113   :  { %v140_v54 = vadd.f32 %v139_v52, %v135_v51 }
 0x115   :  { %v141_v55 = vrot.slane %v140_v54, 2 }
 0x117   :  { %v142_v56 = vadd.f32 %v141_v55, %v140_v54  ;;  %v466_v54 = vld [vmem:[%s954_s3 + $0x4] ss:$0 sm:$0xff] }
 0x119   :  { %v143_v57 = vrot.slane %v142_v56, 1 }
 0x11b   :  { %v144_v58 = vadd.f32 %v143_v57, %v142_v56 }
 0x11d   :  { %v146_v59 = vmul.f32 0.125, %v144_v58 }
 0x11f   :  { %v147_v60 = vsub.f32 %v135_v51, %v146_v59 }
 0x121   :  { %v148_v61 = vmul.f32 %v147_v60, %v147_v60 }
 0x123   :  { %v149_v62 = vrot.slane %v148_v61, 4 }
 0x125   :  { %v150_v63 = vadd.f32 %v149_v62, %v148_v61 }
 0x127   :  { %v151_v2 = vrot.slane %v150_v63, 2 }
 0x129   :  { %v152_v3 = vadd.f32 %v151_v2, %v150_v63 }
 0x12b   :  { %v153_v4 = vrot.slane %v152_v3, 1 }
 0x12d   :  { %v154_v5 = vadd.f32 %v153_v4, %v152_v3 }
 0x12f   :  { %v155_v6 = vmul.f32 0.125, %v154_v5 }
 0x131   :  { %v156_v7 = vadd.f32 1e-05, %v155_v6 }
 0x133   :  { %717 = vrsqrt.f32 %v156_v7 }
 0x13d   :  { %v718_v12 = vpop.eup %717 }
 0x13e   :  { %v158_v13 = vmul.f32 %v718_v12, %v57_v10 }
 0x140   :  { %v162_v14 = vrot.slane %v158_v13, %v161_v11 }
 0x142   :  { %v163_v16 = vmul.f32 %v162_v14, %v147_v60 }
 0x144   :  { %v168_v17 = vadd.f32 %v463_v15, %v163_v16 }
 0x146   :  { %v169_v18 = vmax.f32 %v168_v17, 0.0 }
 0x148   :  { %561 = vmatmul.mubr.f32.vlgmr.msra.gmra.mrb[0].mxu1 %v169_v18 }
 0x149   :  { %630 = vmatprep.mubr.msk.f32.mxu1 %vm821_vm0, %v822_v1  ;;  %686 = vmatpush3.bf16.msra.mxu1 %v685_v25  ;;  %v360_v1 = vld [vmem:[#allocation7 + $0x130] sm:$0xff] }
 0x14a   :  { %687 = vmatprep.subr.bf16.mxu1 %v820_v0  ;;  %v694_v32 = vpack.c.bf16 %v361_v31, %v360_v1 }
 0x14d   :  { %689 = vmatpush3.bf16.msra.mxu1 %v688_v27 }
 0x14e   :  { %690 = vmatprep.subr.bf16.mxu1 %v820_v0 }
 0x151   :  { %692 = vmatpush3.bf16.msra.mxu1 %v691_v30 }
 0x152   :  { %693 = vmatprep.subr.bf16.mxu1 %v820_v0 }
 0x155   :  { %695 = vmatpush3.bf16.msra.mxu1 %v694_v32 }
 0x156   :  { %696 = vmatprep.subr.bf16.mxu1 %v820_v0 }
 0x159   :  { %698 = vmatpush3.bf16.msra.mxu1 %v697_v35 }
 0x15a   :  { %699 = vmatprep.subr.bf16.mxu1 %v820_v0 }
 0x15d   :  { %701 = vmatpush3.bf16.msra.mxu1 %v700_v38 }
 0x15e   :  { %702 = vmatprep.subr.bf16.mxu1 %v820_v0 }
 0x161   :  { %704 = vmatpush3.bf16.msra.mxu1 %v703_v41 }
 0x162   :  { %705 = vmatprep.subr.bf16.mxu1 %v820_v0 }
 0x165   :  { %707 = vmatpush3.bf16.msra.mxu1 %v706_v49 }
 0x21b   :  { %v256_v43 = vpop.f32.mrb[0].mxu1 }
 0x21c   :  { %v257_v44 = vadd.f32 %v464_v42, %v256_v43  ;;  %v562_v45 = vpop.f32.mrb[1].mxu1 }
 0x21e   :  { %v260_v46 = vmax.f32 %v257_v44, 0.0 }
 0x220   :  { %596 = vmatmul.mubr.f32.vlgmr.msra.gmra.mrb[2].mxu0 %v260_v46 }
 0x2f3   :  { %v348_v51 = vpop.f32.mrb[2].mxu0 }
 0x2f4   :  { %v349_v52 = vadd.f32 %v465_v50, %v348_v51  ;;  %v597_v0 = vpop.f32.mrb[3].mxu0 }
 0x2f6   :  { %v352_v53 = vmax.f32 %v349_v52, 0.0 }
 0x2f8   :  { %631 = vmatmul.mubr.f32.vlgmr.msra.gmra.mrb[2].mxu1 %v352_v53 }
 0x3cb   :  { %v440_v55 = vpop.f32.mrb[2].mxu1 }
 0x3cc   :  { %v441_v56 = vadd.f32 %v466_v54, %v440_v55  ;;  %v632_v57 = vpop.f32.mrb[3].mxu1 }
 0x3ce   :  { %719 = vtanh.f32 %v441_v56 }
 0x3d8   :  { %v720_v58 = vpop.eup %719 }
 0x3d9   :  { %445 = vst [vmem:[#allocation8] sm:$0xff] %v720_v58 }
 0x3da   :  { %798 = shalt.err (!%p795_p0)
}
 0x3db   :  { %s799_s3 = scalar_lea.hbm %s955_s4, 128 }
 0x3dc   :  { %p800_p1 = scmp.ne.s32.totalorder %s955_s4, %s799_s3  ;;  %p803_p2 = scmp.lt.u32.totalorder %s799_s3, %s955_s4 }
 0x3de   :  { %p805_p3 = pnand %p803_p2, %p800_p1 }
 0x3e0   :  { %808 = shalt.err (!%p805_p3)
}
 0x3e1   :  { %455 = dma.vmem_to_hbm [thread:$0]  %s453_s9, 128, %s955_s4, [#allocation4]  }
 0x3e2   :  { %813 = dma.done.wait [#allocation4], 128  }
 0x3e3   :  { %814 = vsyncadd [#allocation4], 4294967168 }
 0x3e4   :  { %459 = vsyncpa [#allocation3], 1 }
 0x3e5   :  { %460 = vsyncpa [#allocation6], 1 }
 0x3e6   :  { %461 = vsyncpa [#allocation4], 1 }

</bundles_post_ra>
